<compile_context>
chip_gen: v6e
topology: v6e:2x2x1
jax: 0.10.0
libtpu: 0.0.40
codegen_flags: <defaults>
</compile_context>

<pallas_src>
import numpy as np
import jax
import jax.numpy as jnp
from jax import lax
from jax.experimental import pallas as pl
from jax.experimental.pallas import tpu as pltpu

LANE = 128   # TPU lane width (last block dim)


# ----------------------------------------------------------------------------
# Static tables (mirrors SPH_CAL.__init__)
# ----------------------------------------------------------------------------
def _sph_tables(max_l: int):
    L = max_l + 1
    tmp = np.arange(L, dtype=np.float64)
    with np.errstate(divide="ignore"):
        prefactor1 = -np.sqrt(1.0 + 0.5 / tmp)          # [0] is -inf, never used
    prefactor2 = np.sqrt(2.0 * tmp + 3.0)
    ar = np.arange(L, dtype=np.int64)
    ls = ar * ar
    num_lm = L * (L + 1) // 2
    coeff_a = np.zeros(num_lm, dtype=np.float64)
    coeff_b = np.zeros(num_lm, dtype=np.float64)
    pt = np.zeros((L, L), dtype=np.int64)
    pt_rev = np.zeros((L, L), dtype=np.int64)
    yr = np.zeros((L, L), dtype=np.int64)
    yr_rev = np.zeros((L, L), dtype=np.int64)
    for l in range(L):
        pt[l, 0:l + 1] = ar[0:l + 1] + l * (l + 1) // 2
        pt_rev[l, 1:l] = l - ar[1:l] + l * (l + 1) // 2
        yr[l, 0:l + 1] = ls[l] + l + ar[0:l + 1]
        yr_rev[l, 0:l + 1] = ls[l] + ar[0:l + 1]
        if l >= 1:
            coeff_a[pt[l, 0:l]] = np.sqrt(
                (4.0 * ls[l] - 1.0) / (ls[l] - ls[0:l]).astype(np.float64))
            with np.errstate(invalid="ignore"):
                coeff_b[pt[l, 0:l]] = -np.sqrt(
                    (ls[l - 1] - ls[0:l]).astype(np.float64)
                    / (4.0 * ls[l - 1] - 1.0))
    return prefactor1, prefactor2, coeff_a, coeff_b, pt, pt_rev, yr, yr_rev


# ----------------------------------------------------------------------------
# Pallas kernel
# ----------------------------------------------------------------------------
def make_sph_kernel(max_l: int, chunk: int):
    if max_l < 1:
        raise ValueError("max_l must be >= 1")
    L = max_l + 1
    dim_out = L * L          # == min(9, L*L) for max_l in {1,2}; L*L for max_l>=2
    prefactor1, prefactor2, coeff_a, coeff_b, pt, pt_rev, yr, yr_rev = \
        _sph_tables(max_l)

    sqrt2_rev = float(np.sqrt(0.5))
    sqrt2pi_rev = float(np.sqrt(0.5 / np.pi))
    hc1 = float(np.sqrt(15.0 / 4.0 / np.pi))
    hc2 = float(np.sqrt(5.0 / 16.0 / np.pi))
    hc3 = float(np.sqrt(15.0 / 16.0 / np.pi))
    c00 = sqrt2pi_rev * sqrt2_rev

    def kernel(cart_ref, sph_ref):
        # cart_ref: (3, S, 128)   sph_ref: (dim_out, S, 128)
        S = cart_ref.shape[1]
        assert S % chunk == 0, (S, chunk)
        out_dtype = sph_ref.dtype

        # l=0 row is a constant: hoisted out of the chunk loop, one wide store
        # per grid step (JAX does not CSE broadcast_in_dim).
        sph_ref[0, :, :] = jnp.full((S, LANE), c00, dtype=out_dtype)

        # Walk the block in `chunk`-sublane steps: every intermediate row is
        # one full packed vreg; rows are stored as soon as they are produced
        # and only the l-1 / l-2 recursion levels stay live.
        def chunk_body(c, carry):
            r0 = pl.multiple_of(c * chunk, chunk)
            x = cart_ref[0, pl.ds(r0, chunk), :].astype(jnp.float32)
            y = cart_ref[1, pl.ds(r0, chunk), :].astype(jnp.float32)
            z = cart_ref[2, pl.ds(r0, chunk), :].astype(jnp.float32)
            d_sq = x * x + y * y + z * z   # |r|^2 (sqrt in torch ref is redundant)

            rows = {}

            def put(idx, val):
                idx = int(idx)
                rows[idx] = val
                sph_ref[idx, pl.ds(r0, chunk), :] = val.astype(out_dtype)

            put(1, float(prefactor1[1]) * sqrt2pi_rev * y)
            put(2, float(prefactor2[0]) * sqrt2_rev * sqrt2pi_rev * z)
            put(3, float(prefactor1[1]) * sqrt2pi_rev * x)

            if L > 2:  # torch: self.max_l[0] > 2.5
                put(4, hc1 * x * y)
                put(5, -hc1 * y * z)
                put(6, hc2 * (3.0 * z * z - d_sq))
                put(7, -hc1 * x * z)
                put(8, hc3 * (x * x - y * y))

                # recursion for l = 3 .. max_l (unrolled; all indices static)
                for l in range(3, L):
                    p1 = float(prefactor1[l])
                    p2 = float(prefactor2[l - 1])
                    base = l * l
                    top = rows[int(yr[l - 1, l - 1])]
                    bot = rows[int(yr_rev[l - 1, 0])]
                    # sph1 / sph2
                    put(base + 0, p1 * (x * bot + y * top))
                    put(base + 1, p2 * z * bot)
                    # sph3 (l-2 rows)
                    for i in range(l - 2):
                        ca = float(coeff_a[int(pt_rev[l, 2 + i])])
                        cb = float(coeff_b[int(pt_rev[l, 2 + i])])
                        put(base + 2 + i,
                            ca * (z * rows[int(yr_rev[l - 1, 1 + i])]
                                  + cb * d_sq * rows[int(yr_rev[l - 2, i])]))
                    # sph4 (l-1 rows)
                    for i in range(l - 1):
                        ca = float(coeff_a[int(pt[l, i])])
                        cb = float(coeff_b[int(pt[l, i])])
                        put(base + l + i,
                            ca * (z * rows[int(yr[l - 1, i])]
                                  + cb * d_sq * rows[int(yr[l - 2, i])]))
                    # sph5 / sph6
                    put(base + 2 * l - 1, p2 * z * top)
                    put(base + 2 * l, p1 * (x * top - y * bot))
                    # rolling window: only levels l-1 and l are needed next
                    for k in [k for k in rows if k < (l - 1) * (l - 1)]:
                        del rows[k]
            return carry

        lax.fori_loop(0, S // chunk, chunk_body, 0)

    return kernel, dim_out


# ----------------------------------------------------------------------------
# Wrapper
# ----------------------------------------------------------------------------
def _vmem_budgets():
    """(pipeline-buffer budget, scoped-vmem limit) per TPU generation."""
    try:
        kind = jax.devices()[0].device_kind.lower()
    except Exception:
        kind = ""
    if "v7" in kind or "7x" in kind:
        # v7x: 64 MiB VMEM per TensorCore -> keep pipeline buffers well inside.
        return 28 * 2**20, 44 * 2**20
    if "v6" in kind or "v5" in kind:
        # v5e / v6e: 128 MiB VMEM per TensorCore.
        return 48 * 2**20, 64 * 2**20
    return 24 * 2**20, 40 * 2**20   # conservative default (v4 / unknown)


def sph_cal_pallas(cart, max_l: int = 3, block_points: int = 131072):
    """cart: (3, *rest) float array -> ((max_l+1)^2, *rest) spherical harmonics."""
    assert cart.shape[0] == 3, "first axis of cart must be xyz (size 3)"
    out_dtype = cart.dtype
    itemsize = jnp.dtype(out_dtype).itemsize
    # chunk rows per inner step so each per-row store is one full packed vreg:
    # 8 for f32, 16 for bf16/f16, 32 for 1-byte dtypes (math stays f32).
    chunk = int(min(32, max(8, 32 // max(1, itemsize))))

    kernel, dim_out = make_sph_kernel(max_l, chunk)
    rest = cart.shape[1:]
    n = int(np.prod(rest)) if rest else 1

    n128 = -(-n // LANE)                 # 128-lane rows needed
    n128_eff = max(n128, chunk)          # at least one chunk of rows

    vmem_budget, vmem_limit = _vmem_budgets()
    # S = sublane rows per block.  Caps:
    #  (a) double-buffered in+out pipeline blocks stay inside a generation-aware
    #      VMEM budget (v7x: 28 MiB, v5e/v6e: 48 MiB),
    #  (b) large inputs still get >= ~8 grid steps (pipelining; v7x shards the
    #      "parallel" grid axis across its 2 TensorCores),
    #  (c) the block never exceeds the array extent (boundary block is clipped
    #      by Pallas, so no post-kernel full-output copy for ragged N).
    bytes_per_row = (3 + dim_out) * LANE * itemsize * 2   # in+out, double-buffered
    s_target = max(chunk, block_points // LANE)
    s_vmem = max(chunk, vmem_budget // bytes_per_row)
    s_par = max(chunk, n128_eff // 8)
    s_data = n128_eff
    S = min(s_target, s_vmem, s_par, s_data)
    S = max(chunk, (S // chunk) * chunk)

    grid = pl.cdiv(n128_eff, S)
    n_pad = n128_eff * LANE

    cart2 = jnp.reshape(cart, (3, n))
    if n_pad != n:
        cart2 = jnp.pad(cart2, ((0, 0), (0, n_pad - n)))
    cart3 = cart2.reshape(3, n128_eff, LANE)

    cost = pl.CostEstimate(
        flops=4 * dim_out * n_pad,
        transcendentals=0,
        bytes_accessed=(3 + dim_out) * itemsize * n_pad)

    out = pl.pallas_call(
        kernel,
        out_shape=jax.ShapeDtypeStruct((dim_out, n128_eff, LANE), out_dtype),
        grid_spec=pltpu.PrefetchScalarGridSpec(
            num_scalar_prefetch=0,
            grid=(grid,),
            in_specs=[pl.BlockSpec((3, S, LANE), lambda i: (0, i, 0))],
            out_specs=pl.BlockSpec((dim_out, S, LANE), lambda i: (0, i, 0)),
        ),
        compiler_params=pltpu.CompilerParams(
            dimension_semantics=("parallel",),
            vmem_limit_bytes=int(vmem_limit)),
        cost_estimate=cost,
    )(cart3)

    out = out.reshape(dim_out, n_pad)
    if n_pad != n:
        # TODO(synk): only non-lane-aligned N pays this slice (at most one chunk
        # of padded rows); lane-aligned N with n128 >= chunk has no copy at all.
        out = out[:, :n]
    return out.reshape((dim_out,) + rest)


# ----------------------------------------------------------------------------
# Pure-numpy reference (mirrors the PyTorch forward exactly)
# ----------------------------------------------------------------------------
def sph_cal_ref(cart_np, max_l: int = 3):
    L = max_l + 1
    prefactor1, prefactor2, coeff_a, coeff_b, pt, pt_rev, yr, yr_rev = \
        _sph_tables(max_l)
    sqrt2_rev = np.sqrt(0.5)
    sqrt2pi_rev = np.sqrt(0.5 / np.pi)
    hc1 = np.sqrt(15.0 / 4.0 / np.pi)
    hc2 = np.sqrt(5.0 / 16.0 / np.pi)
    hc3 = np.sqrt(15.0 / 16.0 / np.pi)

    x, y, z = cart_np[0], cart_np[1], cart_np[2]
    dist = np.sqrt(x * x + y * y + z * z)
    d_sq = dist * dist

    dim0 = min(9, L * L)
    rows = [None] * dim0
    rows[0] = np.full_like(x, sqrt2pi_rev * sqrt2_rev)
    rows[1] = prefactor1[1] * sqrt2pi_rev * y
    rows[2] = prefactor2[0] * sqrt2_rev * sqrt2pi_rev * z
    rows[3] = prefactor1[1] * sqrt2pi_rev * x
    if L > 2:
        rows[4] = hc1 * x * y
        rows[5] = -hc1 * y * z
        rows[6] = hc2 * (3.0 * z * z - d_sq)
        rows[7] = -hc1 * x * z
        rows[8] = hc3 * (x * x - y * y)
        for l in range(3, L):
            p1, p2 = prefactor1[l], prefactor2[l - 1]
            new = [p1 * (x * rows[yr_rev[l - 1, 0]] + y * rows[yr[l - 1, l - 1]]),
                   p2 * z * rows[yr_rev[l - 1, 0]]]
            for i in range(l - 2):
                ca = coeff_a[pt_rev[l, 2 + i]]
                cb = coeff_b[pt_rev[l, 2 + i]]
                new.append(ca * (z * rows[yr_rev[l - 1, 1 + i]]
                                 + cb * d_sq * rows[yr_rev[l - 2, i]]))
            for i in range(l - 1):
                ca = coeff_a[pt[l, i]]
                cb = coeff_b[pt[l, i]]
                new.append(ca * (z * rows[yr[l - 1, i]]
                                 + cb * d_sq * rows[yr[l - 2, i]]))
            new.append(p2 * z * rows[yr[l - 1, l - 1]])
            new.append(p1 * (x * rows[yr[l - 1, l - 1]]
                             - y * rows[yr_rev[l - 1, 0]]))
            rows.extend(new)
    return np.stack(rows, axis=0).astype(cart_np.dtype)


# ----------------------------------------------------------------------------
if __name__ == "__main__":
    key = jax.random.PRNGKey(0)
    k1, k2, k3 = jax.random.split(key, 3)

    # test 1: small shape (256 points -> padded to one 8x128 chunk, then sliced)
    cart = jax.random.normal(k1, (3, 8, 32), dtype=jnp.float32)
    out = jax.block_until_ready(sph_cal_pallas(cart, max_l=3))
    ref = sph_cal_ref(np.asarray(cart), max_l=3)
    assert out.shape == ref.shape, (out.shape, ref.shape)
    np.testing.assert_allclose(np.asarray(out), ref, rtol=1e-4, atol=1e-4)

    # test 2: lane-aligned shape, multi-step grid, deeper recursion (max_l=4)
    cart2 = jax.random.normal(k2, (3, 16, 128), dtype=jnp.float32)
    out2 = jax.block_until_ready(sph_cal_pallas(cart2, max_l=4))
    ref2 = sph_cal_ref(np.asarray(cart2), max_l=4)
    assert out2.shape == ref2.shape, (out2.shape, ref2.shape)
    np.testing.assert_allclose(np.asarray(out2), ref2, rtol=1e-4, atol=1e-4)

    # test 3: row count not a multiple of the block -> exercises the clipped
    # boundary block (no post-kernel output copy), max_l=2 (no recursion loop)
    cart3 = jax.random.normal(k3, (3, 20, 128), dtype=jnp.float32)
    out3 = jax.block_until_ready(sph_cal_pallas(cart3, max_l=2))
    ref3 = sph_cal_ref(np.asarray(cart3), max_l=2)
    assert out3.shape == ref3.shape, (out3.shape, ref3.shape)
    np.testing.assert_allclose(np.asarray(out3), ref3, rtol=1e-4, atol=1e-4)

    print("KERNEL_OK")
</pallas_src>

<mosaic_0001>
module attributes {stable_mosaic.version = 11 : i64} {
  func.func @kernel(%arg0: i32, %arg1: memref<3x8x128xf32, #tpu.memory_space<vmem>>, %arg2: memref<16x8x128xf32, #tpu.memory_space<vmem>>) attributes {dimension_semantics = [#tpu.dimension_semantics<parallel>], iteration_bounds = array<i64: 1>, scalar_prefetch = 0 : i64, scratch_operands = 0 : i64, tpu.core_type = #tpu.core_type<tc>, window_params = [{transform_indices = @transform_0, window_bounds = array<i64: 3, 8, 128>}, {transform_indices = @transform_1, window_bounds = array<i64: 16, 8, 128>}]} {
    %cst = arith.constant 0.282094806 : f32
    %0 = vector.broadcast %cst : f32 to vector<8x128xf32>
    %c0 = arith.constant 0 : index
    %c0_0 = arith.constant 0 : index
    %c0_1 = arith.constant 0 : index
    %1 = vector.load %arg2[%c0, %c0_0, %c0_1] : memref<16x8x128xf32, #tpu.memory_space<vmem>>, vector<1x8x128xf32>
    %2 = vector.shape_cast %1 : vector<1x8x128xf32> to vector<8x128xf32>
    %3 = vector.shape_cast %0 : vector<8x128xf32> to vector<1x8x128xf32>
    tpu.vector_store %arg2[%c0, %c0_0, %c0_1], %3 {strides = array<i32>} : memref<16x8x128xf32, #tpu.memory_space<vmem>>, vector<1x8x128xf32>,
    %c0_i32 = arith.constant 0 : i32
    %c8_i32 = arith.constant 8 : i32
    %4 = arith.muli %c0_i32, %c8_i32 : i32
    %5 = tpu.assume_multiple %4, 8 : i32
    %c0_2 = arith.constant 0 : index
    %6 = arith.index_cast %5 : i32 to index
    %c0_3 = arith.constant 0 : index
    %7 = vector.load %arg1[%c0_2, %6, %c0_3] : memref<3x8x128xf32, #tpu.memory_space<vmem>>, vector<1x8x128xf32>
    %8 = vector.shape_cast %7 : vector<1x8x128xf32> to vector<8x128xf32>
    %c1 = arith.constant 1 : index
    %9 = arith.index_cast %5 : i32 to index
    %c0_4 = arith.constant 0 : index
    %10 = vector.load %arg1[%c1, %9, %c0_4] : memref<3x8x128xf32, #tpu.memory_space<vmem>>, vector<1x8x128xf32>
    %11 = vector.shape_cast %10 : vector<1x8x128xf32> to vector<8x128xf32>
    %c2 = arith.constant 2 : index
    %12 = arith.index_cast %5 : i32 to index
    %c0_5 = arith.constant 0 : index
    %13 = vector.load %arg1[%c2, %12, %c0_5] : memref<3x8x128xf32, #tpu.memory_space<vmem>>, vector<1x8x128xf32>
    %14 = vector.shape_cast %13 : vector<1x8x128xf32> to vector<8x128xf32>
    %15 = arith.mulf %8, %8 : vector<8x128xf32>
    %16 = arith.mulf %11, %11 : vector<8x128xf32>
    %17 = arith.addf %15, %16 : vector<8x128xf32>
    %18 = arith.mulf %14, %14 : vector<8x128xf32>
    %19 = arith.addf %17, %18 : vector<8x128xf32>
    %cst_6 = arith.constant -0.488602519 : f32
    %20 = vector.broadcast %cst_6 : f32 to vector<8x128xf32>
    %21 = arith.mulf %20, %11 : vector<8x128xf32>
    %c1_7 = arith.constant 1 : index
    %22 = arith.index_cast %5 : i32 to index
    %c0_8 = arith.constant 0 : index
    %23 = vector.load %arg2[%c1_7, %22, %c0_8] : memref<16x8x128xf32, #tpu.memory_space<vmem>>, vector<1x8x128xf32>
    %24 = vector.shape_cast %23 : vector<1x8x128xf32> to vector<8x128xf32>
    %25 = vector.shape_cast %21 : vector<8x128xf32> to vector<1x8x128xf32>
    tpu.vector_store %arg2[%c1_7, %22, %c0_8], %25 {strides = array<i32>} : memref<16x8x128xf32, #tpu.memory_space<vmem>>, vector<1x8x128xf32>,
    %cst_9 = arith.constant 0.488602519 : f32
    %26 = vector.broadcast %cst_9 : f32 to vector<8x128xf32>
    %27 = arith.mulf %26, %14 : vector<8x128xf32>
    %c2_10 = arith.constant 2 : index
    %28 = arith.index_cast %5 : i32 to index
    %c0_11 = arith.constant 0 : index
    %29 = vector.load %arg2[%c2_10, %28, %c0_11] : memref<16x8x128xf32, #tpu.memory_space<vmem>>, vector<1x8x128xf32>
    %30 = vector.shape_cast %29 : vector<1x8x128xf32> to vector<8x128xf32>
    %31 = vector.shape_cast %27 : vector<8x128xf32> to vector<1x8x128xf32>
    tpu.vector_store %arg2[%c2_10, %28, %c0_11], %31 {strides = array<i32>} : memref<16x8x128xf32, #tpu.memory_space<vmem>>, vector<1x8x128xf32>,
    %cst_12 = arith.constant -0.488602519 : f32
    %32 = vector.broadcast %cst_12 : f32 to vector<8x128xf32>
    %33 = arith.mulf %32, %8 : vector<8x128xf32>
    %c3 = arith.constant 3 : index
    %34 = arith.index_cast %5 : i32 to index
    %c0_13 = arith.constant 0 : index
    %35 = vector.load %arg2[%c3, %34, %c0_13] : memref<16x8x128xf32, #tpu.memory_space<vmem>>, vector<1x8x128xf32>
    %36 = vector.shape_cast %35 : vector<1x8x128xf32> to vector<8x128xf32>
    %37 = vector.shape_cast %33 : vector<8x128xf32> to vector<1x8x128xf32>
    tpu.vector_store %arg2[%c3, %34, %c0_13], %37 {strides = array<i32>} : memref<16x8x128xf32, #tpu.memory_space<vmem>>, vector<1x8x128xf32>,
    %cst_14 = arith.constant 1.09254849 : f32
    %38 = vector.broadcast %cst_14 : f32 to vector<8x128xf32>
    %39 = arith.mulf %38, %8 : vector<8x128xf32>
    %40 = arith.mulf %39, %11 : vector<8x128xf32>
    %c4 = arith.constant 4 : index
    %41 = arith.index_cast %5 : i32 to index
    %c0_15 = arith.constant 0 : index
    %42 = vector.load %arg2[%c4, %41, %c0_15] : memref<16x8x128xf32, #tpu.memory_space<vmem>>, vector<1x8x128xf32>
    %43 = vector.shape_cast %42 : vector<1x8x128xf32> to vector<8x128xf32>
    %44 = vector.shape_cast %40 : vector<8x128xf32> to vector<1x8x128xf32>
    tpu.vector_store %arg2[%c4, %41, %c0_15], %44 {strides = array<i32>} : memref<16x8x128xf32, #tpu.memory_space<vmem>>, vector<1x8x128xf32>,
    %cst_16 = arith.constant -1.09254849 : f32
    %45 = vector.broadcast %cst_16 : f32 to vector<8x128xf32>
    %46 = arith.mulf %45, %11 : vector<8x128xf32>
    %47 = arith.mulf %46, %14 : vector<8x128xf32>
    %c5 = arith.constant 5 : index
    %48 = arith.index_cast %5 : i32 to index
    %c0_17 = arith.constant 0 : index
    %49 = vector.load %arg2[%c5, %48, %c0_17] : memref<16x8x128xf32, #tpu.memory_space<vmem>>, vector<1x8x128xf32>
    %50 = vector.shape_cast %49 : vector<1x8x128xf32> to vector<8x128xf32>
    %51 = vector.shape_cast %47 : vector<8x128xf32> to vector<1x8x128xf32>
    tpu.vector_store %arg2[%c5, %48, %c0_17], %51 {strides = array<i32>} : memref<16x8x128xf32, #tpu.memory_space<vmem>>, vector<1x8x128xf32>,
    %cst_18 = arith.constant 3.000000e+00 : f32
    %52 = vector.broadcast %cst_18 : f32 to vector<8x128xf32>
    %53 = arith.mulf %52, %14 : vector<8x128xf32>
    %54 = arith.mulf %53, %14 : vector<8x128xf32>
    %55 = arith.subf %54, %19 : vector<8x128xf32>
    %cst_19 = arith.constant 0.31539157 : f32
    %56 = vector.broadcast %cst_19 : f32 to vector<8x128xf32>
    %57 = arith.mulf %56, %55 : vector<8x128xf32>
    %c6 = arith.constant 6 : index
    %58 = arith.index_cast %5 : i32 to index
    %c0_20 = arith.constant 0 : index
    %59 = vector.load %arg2[%c6, %58, %c0_20] : memref<16x8x128xf32, #tpu.memory_space<vmem>>, vector<1x8x128xf32>
    %60 = vector.shape_cast %59 : vector<1x8x128xf32> to vector<8x128xf32>
    %61 = vector.shape_cast %57 : vector<8x128xf32> to vector<1x8x128xf32>
    tpu.vector_store %arg2[%c6, %58, %c0_20], %61 {strides = array<i32>} : memref<16x8x128xf32, #tpu.memory_space<vmem>>, vector<1x8x128xf32>,
    %cst_21 = arith.constant -1.09254849 : f32
    %62 = vector.broadcast %cst_21 : f32 to vector<8x128xf32>
    %63 = arith.mulf %62, %8 : vector<8x128xf32>
    %64 = arith.mulf %63, %14 : vector<8x128xf32>
    %c7 = arith.constant 7 : index
    %65 = arith.index_cast %5 : i32 to index
    %c0_22 = arith.constant 0 : index
    %66 = vector.load %arg2[%c7, %65, %c0_22] : memref<16x8x128xf32, #tpu.memory_space<vmem>>, vector<1x8x128xf32>
    %67 = vector.shape_cast %66 : vector<1x8x128xf32> to vector<8x128xf32>
    %68 = vector.shape_cast %64 : vector<8x128xf32> to vector<1x8x128xf32>
    tpu.vector_store %arg2[%c7, %65, %c0_22], %68 {strides = array<i32>} : memref<16x8x128xf32, #tpu.memory_space<vmem>>, vector<1x8x128xf32>,
    %69 = arith.mulf %8, %8 : vector<8x128xf32>
    %70 = arith.mulf %11, %11 : vector<8x128xf32>
    %71 = arith.subf %69, %70 : vector<8x128xf32>
    %cst_23 = arith.constant 0.546274245 : f32
    %72 = vector.broadcast %cst_23 : f32 to vector<8x128xf32>
    %73 = arith.mulf %72, %71 : vector<8x128xf32>
    %c8 = arith.constant 8 : index
    %74 = arith.index_cast %5 : i32 to index
    %c0_24 = arith.constant 0 : index
    %75 = vector.load %arg2[%c8, %74, %c0_24] : memref<16x8x128xf32, #tpu.memory_space<vmem>>, vector<1x8x128xf32>
    %76 = vector.shape_cast %75 : vector<1x8x128xf32> to vector<8x128xf32>
    %77 = vector.shape_cast %73 : vector<8x128xf32> to vector<1x8x128xf32>
    tpu.vector_store %arg2[%c8, %74, %c0_24], %77 {strides = array<i32>} : memref<16x8x128xf32, #tpu.memory_space<vmem>>, vector<1x8x128xf32>,
    %78 = arith.mulf %8, %40 : vector<8x128xf32>
    %79 = arith.mulf %11, %73 : vector<8x128xf32>
    %80 = arith.addf %78, %79 : vector<8x128xf32>
    %cst_25 = arith.constant -1.08012342 : f32
    %81 = vector.broadcast %cst_25 : f32 to vector<8x128xf32>
    %82 = arith.mulf %81, %80 : vector<8x128xf32>
    %c9 = arith.constant 9 : index
    %83 = arith.index_cast %5 : i32 to index
    %c0_26 = arith.constant 0 : index
    %84 = vector.load %arg2[%c9, %83, %c0_26] : memref<16x8x128xf32, #tpu.memory_space<vmem>>, vector<1x8x128xf32>
    %85 = vector.shape_cast %84 : vector<1x8x128xf32> to vector<8x128xf32>
    %86 = vector.shape_cast %82 : vector<8x128xf32> to vector<1x8x128xf32>
    tpu.vector_store %arg2[%c9, %83, %c0_26], %86 {strides = array<i32>} : memref<16x8x128xf32, #tpu.memory_space<vmem>>, vector<1x8x128xf32>,
    %cst_27 = arith.constant 2.64575124 : f32
    %87 = vector.broadcast %cst_27 : f32 to vector<8x128xf32>
    %88 = arith.mulf %87, %14 : vector<8x128xf32>
    %89 = arith.mulf %88, %40 : vector<8x128xf32>
    %c10 = arith.constant 10 : index
    %90 = arith.index_cast %5 : i32 to index
    %c0_28 = arith.constant 0 : index
    %91 = vector.load %arg2[%c10, %90, %c0_28] : memref<16x8x128xf32, #tpu.memory_space<vmem>>, vector<1x8x128xf32>
    %92 = vector.shape_cast %91 : vector<1x8x128xf32> to vector<8x128xf32>
    %93 = vector.shape_cast %89 : vector<8x128xf32> to vector<1x8x128xf32>
    tpu.vector_store %arg2[%c10, %90, %c0_28], %93 {strides = array<i32>} : memref<16x8x128xf32, #tpu.memory_space<vmem>>, vector<1x8x128xf32>,
    %94 = arith.mulf %14, %47 : vector<8x128xf32>
    %cst_29 = arith.constant -0.44721359 : f32
    %95 = vector.broadcast %cst_29 : f32 to vector<8x128xf32>
    %96 = arith.mulf %95, %19 : vector<8x128xf32>
    %97 = arith.mulf %96, %21 : vector<8x128xf32>
    %98 = arith.addf %94, %97 : vector<8x128xf32>
    %cst_30 = arith.constant 2.091650e+00 : f32
    %99 = vector.broadcast %cst_30 : f32 to vector<8x128xf32>
    %100 = arith.mulf %99, %98 : vector<8x128xf32>
    %c11 = arith.constant 11 : index
    %101 = arith.index_cast %5 : i32 to index
    %c0_31 = arith.constant 0 : index
    %102 = vector.load %arg2[%c11, %101, %c0_31] : memref<16x8x128xf32, #tpu.memory_space<vmem>>, vector<1x8x128xf32>
    %103 = vector.shape_cast %102 : vector<1x8x128xf32> to vector<8x128xf32>
    %104 = vector.shape_cast %100 : vector<8x128xf32> to vector<1x8x128xf32>
    tpu.vector_store %arg2[%c11, %101, %c0_31], %104 {strides = array<i32>} : memref<16x8x128xf32, #tpu.memory_space<vmem>>, vector<1x8x128xf32>,
    %105 = arith.mulf %14, %57 : vector<8x128xf32>
    %cst_32 = arith.constant -0.516397774 : f32
    %106 = vector.broadcast %cst_32 : f32 to vector<8x128xf32>
    %107 = arith.mulf %106, %19 : vector<8x128xf32>
    %108 = arith.mulf %107, %27 : vector<8x128xf32>
    %109 = arith.addf %105, %108 : vector<8x128xf32>
    %cst_33 = arith.constant 1.97202659 : f32
    %110 = vector.broadcast %cst_33 : f32 to vector<8x128xf32>
    %111 = arith.mulf %110, %109 : vector<8x128xf32>
    %c12 = arith.constant 12 : index
    %112 = arith.index_cast %5 : i32 to index
    %c0_34 = arith.constant 0 : index
    %113 = vector.load %arg2[%c12, %112, %c0_34] : memref<16x8x128xf32, #tpu.memory_space<vmem>>, vector<1x8x128xf32>
    %114 = vector.shape_cast %113 : vector<1x8x128xf32> to vector<8x128xf32>
    %115 = vector.shape_cast %111 : vector<8x128xf32> to vector<1x8x128xf32>
    tpu.vector_store %arg2[%c12, %112, %c0_34], %115 {strides = array<i32>} : memref<16x8x128xf32, #tpu.memory_space<vmem>>, vector<1x8x128xf32>,
    %116 = arith.mulf %14, %64 : vector<8x128xf32>
    %cst_35 = arith.constant -0.44721359 : f32
    %117 = vector.broadcast %cst_35 : f32 to vector<8x128xf32>
    %118 = arith.mulf %117, %19 : vector<8x128xf32>
    %119 = arith.mulf %118, %33 : vector<8x128xf32>
    %120 = arith.addf %116, %119 : vector<8x128xf32>
    %cst_36 = arith.constant 2.091650e+00 : f32
    %121 = vector.broadcast %cst_36 : f32 to vector<8x128xf32>
    %122 = arith.mulf %121, %120 : vector<8x128xf32>
    %c13 = arith.constant 13 : index
    %123 = arith.index_cast %5 : i32 to index
    %c0_37 = arith.constant 0 : index
    %124 = vector.load %arg2[%c13, %123, %c0_37] : memref<16x8x128xf32, #tpu.memory_space<vmem>>, vector<1x8x128xf32>
    %125 = vector.shape_cast %124 : vector<1x8x128xf32> to vector<8x128xf32>
    %126 = vector.shape_cast %122 : vector<8x128xf32> to vector<1x8x128xf32>
    tpu.vector_store %arg2[%c13, %123, %c0_37], %126 {strides = array<i32>} : memref<16x8x128xf32, #tpu.memory_space<vmem>>, vector<1x8x128xf32>,
    %cst_38 = arith.constant 2.64575124 : f32
    %127 = vector.broadcast %cst_38 : f32 to vector<8x128xf32>
    %128 = arith.mulf %127, %14 : vector<8x128xf32>
    %129 = arith.mulf %128, %73 : vector<8x128xf32>
    %c14 = arith.constant 14 : index
    %130 = arith.index_cast %5 : i32 to index
    %c0_39 = arith.constant 0 : index
    %131 = vector.load %arg2[%c14, %130, %c0_39] : memref<16x8x128xf32, #tpu.memory_space<vmem>>, vector<1x8x128xf32>
    %132 = vector.shape_cast %131 : vector<1x8x128xf32> to vector<8x128xf32>
    %133 = vector.shape_cast %129 : vector<8x128xf32> to vector<1x8x128xf32>
    tpu.vector_store %arg2[%c14, %130, %c0_39], %133 {strides = array<i32>} : memref<16x8x128xf32, #tpu.memory_space<vmem>>, vector<1x8x128xf32>,
    %134 = arith.mulf %8, %73 : vector<8x128xf32>
    %135 = arith.mulf %11, %40 : vector<8x128xf32>
    %136 = arith.subf %134, %135 : vector<8x128xf32>
    %cst_40 = arith.constant -1.08012342 : f32
    %137 = vector.broadcast %cst_40 : f32 to vector<8x128xf32>
    %138 = arith.mulf %137, %136 : vector<8x128xf32>
    %c15 = arith.constant 15 : index
    %139 = arith.index_cast %5 : i32 to index
    %c0_41 = arith.constant 0 : index
    %140 = vector.load %arg2[%c15, %139, %c0_41] : memref<16x8x128xf32, #tpu.memory_space<vmem>>, vector<1x8x128xf32>
    %141 = vector.shape_cast %140 : vector<1x8x128xf32> to vector<8x128xf32>
    %142 = vector.shape_cast %138 : vector<8x128xf32> to vector<1x8x128xf32>
    tpu.vector_store %arg2[%c15, %139, %c0_41], %142 {strides = array<i32>} : memref<16x8x128xf32, #tpu.memory_space<vmem>>, vector<1x8x128xf32>,
    %c1_i32 = arith.constant 1 : i32
    return
  }
  func.func @transform_0(%arg0: i32) -> (i32, i32, i32) {
    %c0_i32 = arith.constant 0 : i32
    %c0_i32_0 = arith.constant 0 : i32
    %c0_i32_1 = arith.constant 0 : i32
    return %c0_i32, %arg0, %c0_i32_0 : i32, i32, i32
  }
  func.func @transform_1(%arg0: i32) -> (i32, i32, i32) {
    %c0_i32 = arith.constant 0 : i32
    %c0_i32_0 = arith.constant 0 : i32
    %c0_i32_1 = arith.constant 0 : i32
    return %c0_i32, %arg0, %c0_i32_0 : i32, i32, i32
  }
}

</mosaic_0001>

<bundles_post_ra>
// kernel: tpu_custom_call.1
= control target key start
LH: loop header
LB: loop body
LE: loop exit
PB: predicated region body
PF: predicated region fallthrough
CT: control target
= control target key end

     0   :  { %6 = vsyncpa [#allocation3], 0  ;;  %s229_s0 = inlined_call_operand.hbm [shape: f32[3,8,128], index: 0, kind: input, shape index: {}]   ;;  %s230_s1 = inlined_call_operand.hbm [shape: f32[16,8,128], index: 1, kind: output, shape index: {}]  }
   0x1   :  { %7 = vsyncpa [#allocation4], 0  ;;  %s202_s6 = smov [#allocation2]  }
   0x2   :  { %s13_s7 = sshll.u32 %s202_s6, 4  ;;  %s14_s7 = int_to_ptr.vmem [resolvable:$true] %s13_s7 }
   0x3   :  { %s166_s8 = scalar_lea.vmem %s14_s7, 384  ;;  %p171_p1 = scmp.lt.s32.totalorder %s14_s7, %s14_s7 }
   0x4   :  { %p167_p0 = scmp.ne.s32.totalorder %s14_s7, %s166_s8  ;;  %p172_p2 = scmp.lt.s32.totalorder %s166_s8, %s166_s8 }
   0x6   :  { %p173_p3 = por %p172_p2, %p171_p1 }
   0x8   :  { %p174_p4 = pnand %p173_p3, %p167_p0 }
   0xa   :  { %177 = shalt.err (!%p174_p4)
}
   0xb   :  { %s203_s9 = smov 128   ;;  %s204_s10 = smov 8  }
   0xc   :  { %19 = dma.hbm_to_vmem [thread:$0]  %s229_s0, 384, %s14_s7, [#allocation3], %s203_s9, %s203_s9, %s204_s10  }
   0xd   :  { %198 = dma.done.wait [#allocation3], 384  }
   0xe   :  { %199 = vsyncadd [#allocation3], 4294966912  ;;  %v205_v0 = vmov 0.2820948   ;;  %v24_v1 = vld [vmem:[#allocation2] sm:$0xff]  ;;  %v27_v2 = vld [vmem:[#allocation2 + $0x8] sm:$0xff] }
   0xf   :  { %23 = vst [vmem:[#allocation5] sm:$0xff] %v205_v0  ;;  %v30_v3 = vld [vmem:[#allocation2 + $0x10] sm:$0xff]  ;;  %v31_v4 = vmul.f32 %v24_v1, %v24_v1  ;;  %v32_v5 = vmul.f32 %v27_v2, %v27_v2  ;;  %v36_v7 = vmul.f32 -0.48860252, %v27_v2  ;;  %v42_v9 = vmul.f32 -0.48860252, %v24_v1 }
  0x10   :  { %v34_v6 = vmul.f32 %v30_v3, %v30_v3  ;;  %v39_v8 = vmul.f32 0.48860252, %v30_v3  ;;  %v46_v10 = vmul.f32 1.0925485, %v24_v1  ;;  %v51_v12 = vmul.f32 -1.0925485, %v27_v2 }
  0x11   :  { %v33_v11 = vadd.f32 %v32_v5, %v31_v4  ;;  %38 = vst [vmem:[#allocation5 + $0x8] sm:$0xff] %v36_v7  ;;  %v56_v13 = vmul.f32 3.0, %v30_v3  ;;  %v63_v14 = vmul.f32 -1.0925485, %v24_v1  ;;  %45 = vst [vmem:[#allocation5 + $0x18] sm:$0xff] %v42_v9  ;;  %v68_v16 = vsub.f32 %v31_v4, %v32_v5  ;;  %s206_s0 = smov [#allocation5]  }
  0x12   :  { %41 = vst [vmem:[#allocation5 + $0x10] sm:$0xff] %v39_v8  ;;  %v47_v15 = vmul.f32 %v46_v10, %v27_v2  ;;  %v80_v17 = vmul.f32 2.6457512, %v30_v3  ;;  %v52_v19 = vmul.f32 %v51_v12, %v30_v3  ;;  %s124_s13 = sshll.u32 %s206_s0, 4  ;;  %s125_s13 = int_to_ptr.vmem [resolvable:$true] %s124_s13 }
  0x13   :  { %v35_v18 = vadd.f32 %v34_v6, %v33_v11  ;;  %v57_v20 = vmul.f32 %v56_v13, %v30_v3  ;;  %v64_v21 = vmul.f32 %v63_v14, %v30_v3  ;;  %v69_v22 = vmul.f32 0.54627424, %v68_v16  ;;  %s178_s14 = scalar_lea.vmem %s125_s13, 2048  ;;  %p183_p6 = scmp.lt.s32.totalorder %s125_s13, %s125_s13 }
  0x14   :  { %50 = vst [vmem:[#allocation5 + $0x20] sm:$0xff] %v47_v15  ;;  %v73_v23 = vmul.f32 %v47_v15, %v24_v1  ;;  %v81_v24 = vmul.f32 %v80_v17, %v47_v15  ;;  %v113_v25 = vmul.f32 %v47_v15, %v27_v2  ;;  %55 = vst [vmem:[#allocation5 + $0x28] sm:$0xff] %v52_v19  ;;  %p179_p5 = scmp.ne.s32.totalorder %s125_s13, %s178_s14  ;;  %p184_p7 = scmp.lt.s32.totalorder %s178_s14, %s178_s14 }
  0x15   :  { %v86_v26 = vmul.f32 -0.4472136, %v35_v18  ;;  %v94_v27 = vmul.f32 -0.5163978, %v35_v18  ;;  %v85_v28 = vmul.f32 %v52_v19, %v30_v3  ;;  %v58_v29 = vsub.f32 %v57_v20, %v35_v18  ;;  %67 = vst [vmem:[#allocation5 + $0x38] sm:$0xff] %v64_v21  ;;  %72 = vst [vmem:[#allocation5 + $0x40] sm:$0xff] %v69_v22 }
  0x16   :  { %v101_v30 = vmul.f32 %v64_v21, %v30_v3  ;;  %v74_v31 = vmul.f32 %v69_v22, %v27_v2  ;;  %84 = vst [vmem:[#allocation5 + $0x50] sm:$0xff] %v81_v24  ;;  %v108_v32 = vmul.f32 %v80_v17, %v69_v22  ;;  %v112_v33 = vmul.f32 %v69_v22, %v24_v1  ;;  %p185_p8 = por %p184_p7, %p183_p6 }
  0x17   :  { %v87_v34 = vmul.f32 %v86_v26, %v36_v7  ;;  %v95_v35 = vmul.f32 %v94_v27, %v39_v8  ;;  %v102_v36 = vmul.f32 %v86_v26, %v42_v9  ;;  %v59_v37 = vmul.f32 0.31539157, %v58_v29 }
  0x18   :  { %v75_v38 = vadd.f32 %v74_v31, %v73_v23  ;;  %111 = vst [vmem:[#allocation5 + $0x70] sm:$0xff] %v108_v32  ;;  %v114_v39 = vsub.f32 %v112_v33, %v113_v25  ;;  %p186_p9 = pnand %p185_p8, %p179_p5 }
  0x19   :  { %62 = vst [vmem:[#allocation5 + $0x30] sm:$0xff] %v59_v37  ;;  %v93_v40 = vmul.f32 %v59_v37, %v30_v3  ;;  %v88_v41 = vadd.f32 %v87_v34, %v85_v28  ;;  %v103_v42 = vadd.f32 %v102_v36, %v101_v30 }
  0x1a   :  { %v76_v43 = vmul.f32 -1.0801234, %v75_v38  ;;  %v115_v44 = vmul.f32 -1.0801234, %v114_v39 }
  0x1b   :  { %v89_v45 = vmul.f32 2.09165, %v88_v41  ;;  %v96_v46 = vadd.f32 %v95_v35, %v93_v40  ;;  %v104_v47 = vmul.f32 2.09165, %v103_v42 }
  0x1c   :  { %79 = vst [vmem:[#allocation5 + $0x48] sm:$0xff] %v76_v43  ;;  %118 = vst [vmem:[#allocation5 + $0x78] sm:$0xff] %v115_v44 }
  0x1d   :  { %92 = vst [vmem:[#allocation5 + $0x58] sm:$0xff] %v89_v45  ;;  %v97_v48 = vmul.f32 1.9720266, %v96_v46  ;;  %107 = vst [vmem:[#allocation5 + $0x68] sm:$0xff] %v104_v47 }
  0x1f   :  { %100 = vst [vmem:[#allocation5 + $0x60] sm:$0xff] %v97_v48 }
  0x20   :  { %189 = shalt.err (!%p186_p9)
}
  0x21   :  { %130 = dma.vmem_to_hbm [thread:$0]  %s125_s13, 2048, %s230_s1, [#allocation4], %s203_s9, %s203_s9, %s204_s10  }
  0x22   :  { %200 = dma.done.wait [#allocation4], 2048  }
  0x23   :  { %201 = vsyncadd [#allocation4], 4294965248 }
  0x24   :  { %134 = vsyncpa [#allocation3], 1 }
  0x25   :  { %135 = vsyncpa [#allocation4], 1 }

</bundles_post_ra>
